<compile_context>
chip_gen: v6e
topology: v6e:2x2x1
jax: 0.10.0
libtpu: 0.0.40
codegen_flags: <defaults>
</compile_context>

<pallas_src>
import functools

import jax
import jax.numpy as jnp
from jax.experimental import pallas as pl
from jax.experimental.pallas import tpu as pltpu

_LANE = 128
_SUBLANE = 8


def _round_up(x: int, m: int) -> int:
    return ((x + m - 1) // m) * m


def _vmem_limit_bytes(*byte_counts: int) -> int:
    need = sum(int(b) for b in byte_counts) + (2 << 20)   # slack for compiler temps
    need = max(need, 8 << 20)
    return int(min(need, 48 << 20))                        # stay under v7x's 64 MiB VMEM


# ---------------------------------------------------------------------------
# Fused single-pass kernel: one (C_pad, HW_pad) image resident per grid step.
# ---------------------------------------------------------------------------
def _fused_kernel(x_ref, w1_ref, b1_ref, w2_ref, b2_ref, o_ref, *, inv_hw):
    x = x_ref[0].astype(jnp.float32)                                  # (C, HW)
    f = jnp.sum(x, axis=-1, keepdims=True) * inv_hw                   # (C, 1) mean
    z1 = jnp.dot(w1_ref[...], f,
                 preferred_element_type=jnp.float32) + b1_ref[...]    # (S, 1)
    h = z1 * jnp.clip(z1 + 3.0, 0.0, 6.0) * (1.0 / 6.0)               # hardswish
    z2 = jnp.dot(w2_ref[...], h,
                 preferred_element_type=jnp.float32) + b2_ref[...]    # (C, 1)
    a = jnp.clip(z2 + 3.0, 0.0, 6.0) * (1.0 / 6.0)                    # hardsigmoid
    o_ref[0] = (a * x).astype(o_ref.dtype)


def _fused_call(x3p, w1p, b1c, w2p, b2c, hw_true):
    N, C_pad, HW_pad = x3p.shape
    S = w1p.shape[0]
    dt_bytes = x3p.dtype.itemsize
    block_bytes = 4 * C_pad * HW_pad * dt_bytes          # 2x in + 2x out (double buffered)
    weight_bytes = 2 * 4 * (2 * S * C_pad + S + C_pad)
    kernel = functools.partial(_fused_kernel, inv_hw=1.0 / float(hw_true))
    return pl.pallas_call(
        kernel,
        out_shape=jax.ShapeDtypeStruct((N, C_pad, HW_pad), x3p.dtype),
        grid_spec=pltpu.PrefetchScalarGridSpec(
            num_scalar_prefetch=0,
            grid=(N,),
            in_specs=[
                pl.BlockSpec((1, C_pad, HW_pad), lambda b: (b, 0, 0)),   # x
                pl.BlockSpec((S, C_pad), lambda b: (0, 0)),              # w1
                pl.BlockSpec((S, 1), lambda b: (0, 0)),                  # b1
                pl.BlockSpec((C_pad, S), lambda b: (0, 0)),              # w2
                pl.BlockSpec((C_pad, 1), lambda b: (0, 0)),              # b2
            ],
            out_specs=pl.BlockSpec((1, C_pad, HW_pad), lambda b: (b, 0, 0)),
        ),
        compiler_params=pltpu.CompilerParams(
            dimension_semantics=("parallel",),
            vmem_limit_bytes=_vmem_limit_bytes(block_bytes, weight_bytes)),
        cost_estimate=pl.CostEstimate(
            flops=2 * N * C_pad * HW_pad + 4 * N * S * C_pad,
            transcendentals=0,
            bytes_accessed=2 * N * C_pad * HW_pad * dt_bytes + weight_bytes),
    )(x3p, w1p, b1c, w2p, b2c)


# ---------------------------------------------------------------------------
# Two-pass path: HW-tiled pooling reduction + batched SE FCs + HW-tiled gating.
# ---------------------------------------------------------------------------
def _pool_sum_kernel(x_ref, sum_ref):
    # Accumulate spatial sums across the HW-tile axis (last grid axis).
    @pl.when(pl.program_id(1) == 0)
    def _():
        sum_ref[...] = jnp.zeros_like(sum_ref)
    partial = jnp.sum(x_ref[0].astype(jnp.float32), axis=-1, keepdims=True)  # (C,1)
    sum_ref[0] = sum_ref[0] + partial


def _gate_kernel(a_ref, x_ref, o_ref):
    a = a_ref[0]                                       # (C_pad, 1), f32 gates
    x = x_ref[0].astype(jnp.float32)                   # (C_pad, T_HW)
    o_ref[0] = (a * x).astype(o_ref.dtype)


def _pick_hw_tile(C_pad: int, HW: int, budget_bytes: int = 16 << 20) -> int:
    # Pass-2 VMEM use ~ 2x(in tile) + 2x(out tile); sized in f32-equivalent bytes.
    max_t = budget_bytes // (4 * C_pad * 4)
    t = max(_LANE, (max_t // _LANE) * _LANE)          # lane-aligned, >=512 when it fits
    t = min(t, 4096)                                   # keep plenty of grid steps
    t = min(t, _round_up(max(HW, _LANE), _LANE))
    return t


def _two_pass_call(x3p, w1, b1, w2, b2, C, hw_true, T):
    N, C_pad, HW_pad = x3p.shape
    dt_bytes = x3p.dtype.itemsize
    grid_t = HW_pad // T

    # ---- Pass 1: per-(batch, channel) spatial sums (HW-tiled reduction). ----
    sums = pl.pallas_call(
        _pool_sum_kernel,
        out_shape=jax.ShapeDtypeStruct((N, C_pad, 1), jnp.float32),
        grid_spec=pltpu.PrefetchScalarGridSpec(
            num_scalar_prefetch=0,
            grid=(N, grid_t),
            in_specs=[pl.BlockSpec((1, C_pad, T), lambda b, t: (b, 0, t))],
            out_specs=pl.BlockSpec((1, C_pad, 1), lambda b, t: (b, 0, 0)),
        ),
        compiler_params=pltpu.CompilerParams(
            dimension_semantics=("parallel", "arbitrary"),
            vmem_limit_bytes=_vmem_limit_bytes(2 * C_pad * T * dt_bytes,
                                               2 * C_pad * 4)),
        cost_estimate=pl.CostEstimate(
            flops=N * C_pad * HW_pad,
            transcendentals=0,
            bytes_accessed=N * C_pad * HW_pad * dt_bytes + N * C_pad * 4),
    )(x3p)

    # ---- Squeeze-excite FCs, batched over N (tiny: two small matmuls). ----
    f = sums[:, :C, 0] * (1.0 / float(hw_true))                        # (N, C) means
    z1 = f @ w1.astype(jnp.float32).T + b1.astype(jnp.float32)[None, :]
    h = z1 * jnp.clip(z1 + 3.0, 0.0, 6.0) * (1.0 / 6.0)                # hardswish
    z2 = h @ w2.astype(jnp.float32).T + b2.astype(jnp.float32)[None, :]
    a = jnp.clip(z2 + 3.0, 0.0, 6.0) * (1.0 / 6.0)                     # hardsigmoid
    if C_pad != C:
        a = jnp.pad(a, ((0, 0), (0, C_pad - C)))
    gates = a[:, :, None]                                              # (N, C_pad, 1)

    # ---- Pass 2: lane-dense elementwise gate, grid=(N, HW/T), all parallel. ----
    out3 = pl.pallas_call(
        _gate_kernel,
        out_shape=jax.ShapeDtypeStruct((N, C_pad, HW_pad), x3p.dtype),
        grid_spec=pltpu.PrefetchScalarGridSpec(
            num_scalar_prefetch=0,
            grid=(N, grid_t),
            in_specs=[
                pl.BlockSpec((1, C_pad, 1), lambda b, t: (b, 0, 0)),     # gates
                pl.BlockSpec((1, C_pad, T), lambda b, t: (b, 0, t)),     # x tile
            ],
            out_specs=pl.BlockSpec((1, C_pad, T), lambda b, t: (b, 0, t)),
        ),
        compiler_params=pltpu.CompilerParams(
            dimension_semantics=("parallel", "parallel"),
            vmem_limit_bytes=_vmem_limit_bytes(4 * C_pad * T * dt_bytes,
                                               2 * C_pad * 4)),
        cost_estimate=pl.CostEstimate(
            flops=N * C_pad * HW_pad,
            transcendentals=0,
            bytes_accessed=2 * N * C_pad * HW_pad * dt_bytes + N * C_pad * 4),
    )(gates, x3p)
    return out3


# ---------------------------------------------------------------------------
# Public wrapper: threshold-switched between the fused and two-pass structures.
# ---------------------------------------------------------------------------
def channel_attention(x_nchw, w1, b1, w2, b2, *,
                      max_fused_block_bytes=24 << 20,
                      force_two_pass=False):
    """x_nchw: (N, C, H, W). w1: (S, C), b1: (S,), w2: (C, S), b2: (C,)."""
    N, C, H, W = x_nchw.shape
    S = w1.shape[0]
    HW = H * W
    dt_bytes = x_nchw.dtype.itemsize

    C_pad = _round_up(C, _SUBLANE)
    x3 = x_nchw.reshape(N, C, HW)

    fused_hw_pad = _round_up(HW, _LANE)
    fused_block_bytes = 4 * C_pad * fused_hw_pad * dt_bytes   # 2x in + 2x out blocks
    use_fused = (not force_two_pass) and fused_block_bytes <= max_fused_block_bytes

    if use_fused:
        HW_pad = fused_hw_pad
        T = None
    else:
        T = _pick_hw_tile(C_pad, HW)
        HW_pad = _round_up(HW, T)

    if C_pad != C or HW_pad != HW:
        x3p = jnp.pad(x3, ((0, 0), (0, C_pad - C), (0, HW_pad - HW)))
    else:
        x3p = x3

    if use_fused:
        w1p = w1.astype(jnp.float32)
        w2p = w2.astype(jnp.float32)
        b2c = b2.astype(jnp.float32).reshape(C, 1)
        if C_pad != C:
            w1p = jnp.pad(w1p, ((0, 0), (0, C_pad - C)))
            w2p = jnp.pad(w2p, ((0, C_pad - C), (0, 0)))
            b2c = jnp.pad(b2c, ((0, C_pad - C), (0, 0)))
        b1c = b1.astype(jnp.float32).reshape(S, 1)
        out3 = _fused_call(x3p, w1p, b1c, w2p, b2c, HW)
    else:
        out3 = _two_pass_call(x3p, w1, b1, w2, b2, C, HW, T)

    if C_pad != C or HW_pad != HW:
        out3 = out3[:, :C, :HW]
    return out3.reshape(N, C, H, W)


# ---------------------------------------------------------------------------
# Pure-JAX reference mirroring the PyTorch forward.
# ---------------------------------------------------------------------------
def channel_attention_ref(x, w1, b1, w2, b2):
    f = jnp.mean(x, axis=(2, 3))                                       # (N, C)
    z1 = f @ w1.T + b1[None, :]                                        # (N, S)
    h = z1 * jnp.clip(z1 + 3.0, 0.0, 6.0) / 6.0
    z2 = h @ w2.T + b2[None, :]                                        # (N, C)
    a = jnp.clip(z2 + 3.0, 0.0, 6.0) / 6.0
    return a[:, :, None, None] * x


def _run_case(key, N, C, H, W, shrink_factor):
    S = max(C // shrink_factor, 1)
    k_x, k_w1, k_b1, k_w2, k_b2 = jax.random.split(key, 5)
    x = jax.random.normal(k_x, (N, C, H, W), dtype=jnp.float32)
    w1 = jax.random.normal(k_w1, (S, C), dtype=jnp.float32) * 0.5
    b1 = jax.random.normal(k_b1, (S,), dtype=jnp.float32) * 0.1
    w2 = jax.random.normal(k_w2, (C, S), dtype=jnp.float32) * 0.5
    b2 = jax.random.normal(k_b2, (C,), dtype=jnp.float32) * 0.1
    ref = channel_attention_ref(x, w1, b1, w2, b2)

    out_fused = jax.block_until_ready(channel_attention(x, w1, b1, w2, b2))
    assert out_fused.shape == (N, C, H, W)
    assert jnp.allclose(out_fused, ref, atol=1e-5, rtol=1e-5), "fused path mismatch"

    out_tiled = jax.block_until_ready(
        channel_attention(x, w1, b1, w2, b2, force_two_pass=True))
    assert out_tiled.shape == (N, C, H, W)
    assert jnp.allclose(out_tiled, ref, atol=1e-5, rtol=1e-5), "two-pass path mismatch"


if __name__ == "__main__":
    key = jax.random.PRNGKey(0)
    k1, k2 = jax.random.split(key)
    # Small shapes consistent with the module (shrink_factor=4).
    _run_case(k1, N=2, C=4, H=16, W=16, shrink_factor=4)    # lane-aligned spatial
    _run_case(k2, N=2, C=12, H=14, W=14, shrink_factor=4)   # exercises C/HW padding
    print("KERNEL_OK")
</pallas_src>

<mosaic_0001>
module attributes {stable_mosaic.version = 11 : i64} {
  func.func @_fused_kernel(%arg0: i32, %arg1: memref<1x8x256xf32, #tpu.memory_space<vmem>>, %arg2: memref<1x8xf32, #tpu.memory_space<vmem>>, %arg3: memref<1x1xf32, #tpu.memory_space<vmem>>, %arg4: memref<8x1xf32, #tpu.memory_space<vmem>>, %arg5: memref<8x1xf32, #tpu.memory_space<vmem>>, %arg6: memref<1x8x256xf32, #tpu.memory_space<vmem>>) attributes {dimension_semantics = [#tpu.dimension_semantics<parallel>], iteration_bounds = array<i64: 2>, scalar_prefetch = 0 : i64, scratch_operands = 0 : i64, tpu.core_type = #tpu.core_type<tc>, window_params = [{transform_indices = @transform_0, window_bounds = array<i64: 1, 8, 256>}, {pipeline_mode = #tpu.pipeline_mode<synchronous>, transform_indices = @transform_1, window_bounds = array<i64: 1, 8>}, {pipeline_mode = #tpu.pipeline_mode<synchronous>, transform_indices = @transform_2, window_bounds = array<i64: 1, 1>}, {pipeline_mode = #tpu.pipeline_mode<synchronous>, transform_indices = @transform_3, window_bounds = array<i64: 8, 1>}, {pipeline_mode = #tpu.pipeline_mode<synchronous>, transform_indices = @transform_4, window_bounds = array<i64: 8, 1>}, {transform_indices = @transform_5, window_bounds = array<i64: 1, 8, 256>}]} {
    %c0 = arith.constant 0 : index
    %c0_0 = arith.constant 0 : index
    %c0_1 = arith.constant 0 : index
    %0 = vector.load %arg1[%c0, %c0_0, %c0_1] : memref<1x8x256xf32, #tpu.memory_space<vmem>>, vector<1x8x256xf32>
    %1 = vector.shape_cast %0 : vector<1x8x256xf32> to vector<8x256xf32>
    %cst = arith.constant dense<0.000000e+00> : vector<8xf32>
    %2 = vector.multi_reduction <add>, %1, %cst [1] : vector<8x256xf32> to vector<8xf32>
    %3 = vector.shape_cast %2 : vector<8xf32> to vector<8x1xf32>
    %cst_2 = arith.constant 3.906250e-03 : f32
    %4 = vector.broadcast %cst_2 : f32 to vector<8x1xf32>
    %5 = arith.mulf %3, %4 : vector<8x1xf32>
    %c0_3 = arith.constant 0 : index
    %c0_4 = arith.constant 0 : index
    %6 = vector.load %arg2[%c0_3, %c0_4] : memref<1x8xf32, #tpu.memory_space<vmem>>, vector<1x8xf32>
    %cst_5 = arith.constant dense<0.000000e+00> : vector<1x1xf32>
    %7 = tpu.matmul %6, %5, %cst_5 {dimension_numbers = #tpu.dot_dimension_numbers<[1], [0], [0], [1], [0, 0, 1, 1], [], []>} : vector<1x8xf32>, vector<8x1xf32>, vector<1x1xf32> -> vector<1x1xf32>
    %c0_6 = arith.constant 0 : index
    %c0_7 = arith.constant 0 : index
    %8 = vector.load %arg3[%c0_6, %c0_7] : memref<1x1xf32, #tpu.memory_space<vmem>>, vector<1x1xf32>
    %9 = arith.addf %7, %8 : vector<1x1xf32>
    %cst_8 = arith.constant 3.000000e+00 : f32
    %10 = vector.broadcast %cst_8 : f32 to vector<1x1xf32>
    %11 = arith.addf %9, %10 : vector<1x1xf32>
    %cst_9 = arith.constant 0.000000e+00 : f32
    %cst_10 = arith.constant 6.000000e+00 : f32
    %12 = vector.broadcast %cst_9 : f32 to vector<1x1xf32>
    %13 = arith.maximumf %12, %11 : vector<1x1xf32>
    %14 = vector.broadcast %cst_10 : f32 to vector<1x1xf32>
    %15 = arith.minimumf %14, %13 : vector<1x1xf32>
    %16 = arith.mulf %9, %15 : vector<1x1xf32>
    %cst_11 = arith.constant 0.166666672 : f32
    %17 = vector.broadcast %cst_11 : f32 to vector<1x1xf32>
    %18 = arith.mulf %16, %17 : vector<1x1xf32>
    %c0_12 = arith.constant 0 : index
    %c0_13 = arith.constant 0 : index
    %19 = vector.load %arg4[%c0_12, %c0_13] : memref<8x1xf32, #tpu.memory_space<vmem>>, vector<8x1xf32>
    %cst_14 = arith.constant dense<0.000000e+00> : vector<8x1xf32>
    %20 = tpu.matmul %19, %18, %cst_14 {dimension_numbers = #tpu.dot_dimension_numbers<[1], [0], [0], [1], [0, 0, 1, 1], [], []>} : vector<8x1xf32>, vector<1x1xf32>, vector<8x1xf32> -> vector<8x1xf32>
    %c0_15 = arith.constant 0 : index
    %c0_16 = arith.constant 0 : index
    %21 = vector.load %arg5[%c0_15, %c0_16] : memref<8x1xf32, #tpu.memory_space<vmem>>, vector<8x1xf32>
    %22 = arith.addf %20, %21 : vector<8x1xf32>
    %cst_17 = arith.constant 3.000000e+00 : f32
    %23 = vector.broadcast %cst_17 : f32 to vector<8x1xf32>
    %24 = arith.addf %22, %23 : vector<8x1xf32>
    %cst_18 = arith.constant 0.000000e+00 : f32
    %cst_19 = arith.constant 6.000000e+00 : f32
    %25 = vector.broadcast %cst_18 : f32 to vector<8x1xf32>
    %26 = arith.maximumf %25, %24 : vector<8x1xf32>
    %27 = vector.broadcast %cst_19 : f32 to vector<8x1xf32>
    %28 = arith.minimumf %27, %26 : vector<8x1xf32>
    %cst_20 = arith.constant 0.166666672 : f32
    %29 = vector.broadcast %cst_20 : f32 to vector<8x1xf32>
    %30 = arith.mulf %28, %29 : vector<8x1xf32>
    %31 = vector.broadcast %30 : vector<8x1xf32> to vector<8x256xf32>
    %32 = arith.mulf %31, %1 : vector<8x256xf32>
    %c0_21 = arith.constant 0 : index
    %c0_22 = arith.constant 0 : index
    %c0_23 = arith.constant 0 : index
    %33 = vector.load %arg6[%c0_21, %c0_22, %c0_23] : memref<1x8x256xf32, #tpu.memory_space<vmem>>, vector<1x8x256xf32>
    %34 = vector.shape_cast %33 : vector<1x8x256xf32> to vector<8x256xf32>
    %35 = vector.shape_cast %32 : vector<8x256xf32> to vector<1x8x256xf32>
    tpu.vector_store %arg6[%c0_21, %c0_22, %c0_23], %35 {strides = array<i32>} : memref<1x8x256xf32, #tpu.memory_space<vmem>>, vector<1x8x256xf32>,
    return
  }
  func.func @transform_0(%arg0: i32) -> (i32, i32, i32) {
    %c0_i32 = arith.constant 0 : i32
    %c0_i32_0 = arith.constant 0 : i32
    %c0_i32_1 = arith.constant 0 : i32
    return %arg0, %c0_i32, %c0_i32_0 : i32, i32, i32
  }
  func.func @transform_1(%arg0: i32) -> (i32, i32) {
    %c0_i32 = arith.constant 0 : i32
    %c0_i32_0 = arith.constant 0 : i32
    %c0_i32_1 = arith.constant 0 : i32
    return %c0_i32, %c0_i32_0 : i32, i32
  }
  func.func @transform_2(%arg0: i32) -> (i32, i32) {
    %c0_i32 = arith.constant 0 : i32
    %c0_i32_0 = arith.constant 0 : i32
    %c0_i32_1 = arith.constant 0 : i32
    return %c0_i32, %c0_i32_0 : i32, i32
  }
  func.func @transform_3(%arg0: i32) -> (i32, i32) {
    %c0_i32 = arith.constant 0 : i32
    %c0_i32_0 = arith.constant 0 : i32
    %c0_i32_1 = arith.constant 0 : i32
    return %c0_i32, %c0_i32_0 : i32, i32
  }
  func.func @transform_4(%arg0: i32) -> (i32, i32) {
    %c0_i32 = arith.constant 0 : i32
    %c0_i32_0 = arith.constant 0 : i32
    %c0_i32_1 = arith.constant 0 : i32
    return %c0_i32, %c0_i32_0 : i32, i32
  }
  func.func @transform_5(%arg0: i32) -> (i32, i32, i32) {
    %c0_i32 = arith.constant 0 : i32
    %c0_i32_0 = arith.constant 0 : i32
    %c0_i32_1 = arith.constant 0 : i32
    return %arg0, %c0_i32, %c0_i32_0 : i32, i32, i32
  }
}

</mosaic_0001>

<bundles_post_ra>
// kernel: tpu_custom_call.1
= control target key start
LH: loop header
LB: loop body
LE: loop exit
PB: predicated region body
PF: predicated region fallthrough
CT: control target
= control target key end

     0   :  { %s883_s0 = inlined_call_operand.hbm [shape: f32[2,8,256], index: 0, kind: input, shape index: {}]   ;;  %s884_s1 = inlined_call_operand.vmem [shape: f32[1,8], index: 1, kind: input, shape index: {}]   ;;  %s885_s2 = inlined_call_operand.<no memory space> [shape: f32[1,1], index: 2, kind: input, shape index: {}]   ;;  %s886_s3 = inlined_call_operand.vmem [shape: f32[8,1], index: 3, kind: input, shape index: {}]   ;;  %s887_s4 = inlined_call_operand.vmem [shape: f32[8,1], index: 4, kind: input, shape index: {}]   ;;  %s888_s5 = inlined_call_operand.hbm [shape: f32[2,8,256], index: 5, kind: output, shape index: {}]  }
   0x1   :  { %v10_v0 = vstv %s885_s2 }
   0x2   :  { %11 = vst [vmem:[#allocation2] sm:$0x1] %v10_v0 }
   0x3   :  { %12 = vsyncpa [#allocation4], 0 }
   0x4   :  { %14 = vsyncpa [#allocation4 + $0x1], 0 }
   0x5   :  { %15 = vsyncpa [#allocation5], 0 }
   0x6   :  { %17 = vsyncpa [#allocation5 + $0x1], 0  ;;  %s723_s20 = smov 0   ;;  %s725_s21 = smov 0  }
   0x7   :  { %s727_s22 = smov 0   ;;  %s729_s23 = smov 0  }
   0x8 LB: > { %s744_s2 = sadd.s32 4294967295, %s683_s23   ;;  %s508_s24 = sadd.s32 4294967294, %s683_s23   ;;  %s683_s23 = sphi %s729_s23, %s905_s23   ;;  %s679_s22 = sphi %s727_s22, %s904_s22   ;;  %s675_s21 = sphi %s725_s21, %s903_s21   ;;  %s671_s20 = sphi %s723_s20, %s902_s20  }
   0x9   : > { %s748_s25 = sadd.s32 1, %s683_s23   ;;  %s30_s26 = sadd.s32 1, %s679_s22 }
   0xa   : > { %s27_s27 = ssub.s32 %s683_s23, %s748_s25  ;;  %p37_p0 = scmp.ne.s32.totalorder %s679_s22, %s675_s21 }
   0xb   : > { %p28_p1 = scmp.eq.s32.totalorder %s27_s27, 0  ;;  %p38_p2 = scmp.eq.s32.totalorder %s683_s23, 0 }
   0xc   : > { %p43_p3 = scmp.ne.s32.totalorder %s675_s21, %s671_s20  ;;  %p44_p4 = scmp.eq.s32.totalorder %s744_s2, 0 }
   0xd   : > { %s760_s28 = scalar_select %p28_p1, %s679_s22, %s30_s26  }
   0xe   : > { %p762_p5 = por %p38_p2, %p37_p0  ;;  %p766_p6 = por %p44_p4, %p43_p3 }
   0xf   : > { %p151_p7 = scmp.eq.s32.totalorder %s744_s2, 1  ;;  %p157_p8 = scmp.eq.s32.totalorder %s508_s24, 1 }
  0x10   : > { %s892_s30 = scalar_select %p766_p6, 1, 0 }
  0x11   : > { %p553_p10 = scmp.lt.s32.totalorder %s683_s23, 2  ;;  %p773_p11 = por %p151_p7, %p37_p0 }
  0x12   : > { %p777_p12 = por %p157_p8, %p43_p3  ;;  %s189_s8 = sand.u32 1, %s679_s22  }
  0x13   : > { %s893_s6 = scalar_select %p773_p11, 1, 0 }
  0x14   : > { %s894_s7 = scalar_select %p777_p12, 1, 0 }
  0x15   : > { %s525_s9 = sshll.u32 %s683_s23, 8  ;;  %s511_s10 = sshll.u32 %s189_s8, 4 }
  0x16   : > { %s786_s13 = scalar_lea.hbm %s883_s0, %s525_s9  ;;  %s193_s14 = scalar_lea.vmem [#allocation3], %s511_s10 }
  0x17   : > { %s201_s15 = sshll.u32 %s193_s14, 4  ;;  %p790_p13 = pnand %p553_p10, %p762_p5  ;;  %s794_s15 = int_to_ptr.vmem [resolvable:$true] %s201_s15 }
  0x18   : > { %s190_s17 = scalar_lea.sflag [#allocation4], %s189_s8  ;;  %s591_s18 = scalar_lea.hbm %s786_s13, 256 }
  0x19   : > { %p592_p2 = scmp.ne.s32.totalorder %s786_s13, %s591_s18  ;;  %p593_p3 = pneg %p790_p13 }
  0x1a   : > { %s596_s26 = scalar_lea.hbm %s883_s0, 512  ;;  %p597_p5 = scmp.lt.s32.totalorder %s786_s13, %s883_s0 }
  0x1b   : > { %p594_p4 = pnand %p593_p3, %p592_p2  ;;  %p598_p8 = scmp.lt.s32.totalorder %s596_s26, %s591_s18 }
  0x1d   : > { %p595_p7 = pneg %p594_p4  ;;  %p599_p10 = por %p598_p8, %p597_p5 }
  0x1f   : > { %p600_p9 = pnand %p599_p10, %p595_p7 }
  0x21   : > { %603 = shalt.err (!%p600_p9)
}
  0x22   : > { %s604_s8 = scalar_lea.vmem %s794_s15, 256  ;;  %s685_s9 = smov [#allocation3]  }
  0x23   : > { %p605_p0 = scmp.ne.s32.totalorder %s794_s15, %s604_s8  ;;  %s609_s10 = sshll.u32 %s685_s9, 4  ;;  %s610_s10 = int_to_ptr.vmem [resolvable:$false] %s609_s10 }
  0x24   : > { %s611_s11 = scalar_lea.vmem %s610_s10, 512  ;;  %p612_p4 = scmp.lt.s32.totalorder %s794_s15, %s610_s10 }
  0x25   : > { %p607_p1 = pnand %p605_p0, %p593_p3  ;;  %p613_p12 = scmp.lt.s32.totalorder %s611_s11, %s604_s8 }
  0x27   : > { %p608_p2 = pneg %p607_p1  ;;  %p614_p11 = por %p613_p12, %p612_p4 }
  0x29   : > { %p615_p6 = pnand %p614_p11, %p608_p2 }
  0x2b   : > { %618 = shalt.err (!%p615_p6)
}
  0x2c   : > { %548 = dma.hbm_to_vmem [thread:$0]  (!%p790_p13), %s786_s13, 256, %s794_s15, %s190_s17  }
  0x2d   : > { %p896_p9 = scmp.lt.s32.totalorder %s683_s23, 3  ;;  %p897_p7 = scmp.ge.s32.totalorder %s683_s23, 1 }
  0x2f   : > { %p207_p0 = pnand %p897_p7, %p896_p9 }
  0x30   : > { %s821_s12 = sand.u32 (!%p207_p0), 1, %s675_s21   ;;  %p898_p6 = scmp.ne.s32.totalorder (!%p207_p0), %s892_s30, 0 }
  0x31   : > { %210 = sbr.rel (%p207_p0) target bundleno = 747 (0x2eb), region = 40  ;;  %s515_s14 = sshll.u32 (!%p207_p0), %s821_s12, 4 }
  0x32   : > { %s213_s18 = scalar_lea.sflag (!%p207_p0), [#allocation4], %s821_s12  ;;  %s216_s16 = scalar_lea.vmem (!%p207_p0), [#allocation3], %s515_s14 }
  0x36   : > { %662 = dma.done.wait (%p898_p6), %s213_s18, 256  }
  0x37   : > { %664 = vsyncadd (%p898_p6), %s213_s18, 4294967040  ;;  %v243_v1 = vld [vmem:[%s216_s16] sm:$0xff]  ;;  %v244_v2 = vld [vmem:[%s216_s16 + $0x8] sm:$0xff]  ;;  %v686_v4 = vmov 0.0   ;;  %vm687_vm0 = vmmov 0   ;;  %vm251_vm1 = vcmask 64512  }
  0x38   : > { %v245_v3 = vadd.f32 %v244_v2, %v243_v1  ;;  %531 = vmatprep.subr.mxu0 %v686_v4  ;;  %536 = vmatprep.subr.mxu1 %v686_v4  ;;  %v249_v7 = vld [vmem:[%s884_s1] sm:$0x1]  ;;  %vm336_vm2 = vcmask 1040384   ;;  %vm332_vm3 = vcmask 7168   ;;  %v688_v18 = vmov 0   ;;  %s526_s26 = sshll.u32 %s744_s2, 8 }
  0x39   : > { %533 = vmatprep.mubr.msk.f32.mxu0 %vm687_vm0, %v686_v4  ;;  %538 = vmatprep.mubr.msk.f32.mxu1 %vm687_vm0, %v686_v4  ;;  %v250_v8 = vld [vmem:[#allocation2] sm:$0x1]  ;;  %s242_s27 = scalar_lea.vmem [#allocation6], %s515_s14  ;;  %s846_s10 = scalar_lea.hbm %s888_s5, %s526_s26 }
  0x3a   : > { %246 = vadd.xlane.f32.xlu0 %v245_v3  ;;  %v330_v17 = vld [vmem:[%s886_s3] sm:$0xff]  ;;  %s438_s29 = sshll.u32 %s242_s27, 4  ;;  %s424_s11 = scalar_lea.sflag [#allocation5], %s821_s12  ;;  %s439_s29 = int_to_ptr.vmem [resolvable:$true] %s438_s29 }
  0x3b   : > { %590 = vset.pattern.permute.xlu0 %v688_v18  ;;  %v331_v19 = vld [vmem:[%s887_s4] sm:$0xff]  ;;  %s619_s18 = scalar_lea.vmem %s439_s29, 256  ;;  %p899_p12 = scmp.ne.s32.totalorder %s893_s6, 0 }
  0x3c   : > { %p620_p11 = scmp.ne.s32.totalorder %s439_s29, %s619_s18  ;;  %s689_s2 = smov [#allocation6]  }
  0x3d   : > { %s623_s14 = sshll.u32 %s689_s2, 4  ;;  %s624_s14 = int_to_ptr.vmem [resolvable:$false] %s623_s14 }
  0x3e   : > { %p621_p13 = pnand %p620_p11, %p899_p12  ;;  %s625_s16 = scalar_lea.vmem %s624_s14, 512 }
  0x3f   : > { %p626_p3 = scmp.lt.s32.totalorder %s439_s29, %s624_s14  ;;  %p627_p5 = scmp.lt.s32.totalorder %s625_s16, %s619_s18 }
  0x40   : > { %p622_p1 = pneg %p621_p13 }
  0x41   : > { %p628_p8 = por %p627_p5, %p626_p3 }
  0x43   : > { %p629_p10 = pnand %p628_p8, %p622_p1 }
  0xc3   : > { %v247_v5 = vpop.xlane.xlu0 %246 }
  0xc4   : > { %v248_v6 = vmul.f32 0.00390625, %v247_v5 }
  0xc6   : > { %532 = vmatpush3.msra.mxu0 %v248_v6 }
  0xc7   : > { %534 = vmatmul.mubr.msk.f32.vlgmr.msra.gmra.mxu0 %vm251_vm1, %v249_v7 }
 0x187   : > { %v321_v9 = vpop.f32.mrf.mxu0 }
 0x188   : > { %v322_v10 = vadd.f32 %v321_v9, %v250_v8 }
 0x189   : > { %v535_v11 = vpop.f32.mrf.mxu0 }
 0x18a   : > { %v325_v12 = vadd.f32 3.0, %v322_v10 }
 0x18c   : > { %v326_v13 = vmax.f32 %v325_v12, 0.0 }
 0x18e   : > { %v327_v14 = vmin.f32 %v326_v13, 6.0 }
 0x190   : > { %v328_v15 = vmul.f32 %v327_v14, %v322_v10 }
 0x192   : > { %v329_v16 = vmul.f32 0.16666667, %v328_v15 }
 0x194   : > { %537 = vmatpush3.msk.msra.mxu1 %vm336_vm2, %v329_v16 }
 0x195   : > { %539 = vmatmul.mubr.msk.f32.vlgmr.msra.gmra.mxu1 %vm332_vm3, %v330_v17 }
 0x255   : > { %v406_v20 = vpop.f32.mrf.mxu1 }
 0x256   : > { %v407_v21 = vadd.f32 %v406_v20, %v331_v19 }
 0x257   : > { %v540_v22 = vpop.f32.mrf.mxu1 }
 0x258   : > { %v410_v23 = vadd.f32 3.0, %v407_v21 }
 0x25a   : > { %v411_v24 = vmax.f32 %v410_v23, 0.0 }
 0x25c   : > { %v412_v25 = vmin.f32 %v411_v24, 6.0 }
 0x25e   : > { %v413_v26 = vmul.f32 0.16666667, %v412_v25 }
 0x260   : > { %416 = vperm.xlu0 %590, %v413_v26  }
 0x2db   : > { %v417_v27 = vpop.permute.xlu0 %416 }
 0x2dc   : > { %v419_v28 = vmul.f32 %v417_v27, %v243_v1  ;;  %v420_v29 = vmul.f32 %v417_v27, %v244_v2 }
 0x2de   : > { %421 = vst [vmem:[%s242_s27] sm:$0xff] %v419_v28  ;;  %422 = vst [vmem:[%s242_s27 + $0x8] sm:$0xff] %v420_v29 }
 0x2df   : > { %632 = shalt.err (!%p629_p10)
}
 0x2e0   : > { %s633_s13 = scalar_lea.hbm %s846_s10, 256  ;;  %s637_s30 = scalar_lea.hbm %s888_s5, 512 }
 0x2e1   : > { %p634_p2 = scmp.ne.s32.totalorder %s846_s10, %s633_s13  ;;  %p638_p7 = scmp.lt.s32.totalorder %s846_s10, %s888_s5 }
 0x2e2   : > { %p639_p0 = scmp.lt.s32.totalorder %s637_s30, %s633_s13 }
 0x2e3   : > { %p635_p4 = pnand %p634_p2, %p899_p12 }
 0x2e4   : > { %p640_p6 = por %p639_p0, %p638_p7 }
 0x2e5   : > { %p636_p9 = pneg %p635_p4 }
 0x2e7   : > { %p641_p11 = pnand %p640_p6, %p636_p9 }
 0x2e9   : > { %644 = shalt.err (!%p641_p11)
}
 0x2ea   : > { %543 = dma.vmem_to_hbm [thread:$0]  (%p899_p12), %s439_s29, 256, %s846_s10, %s424_s11  }
 0x2eb PF: > { %s450_s24 = sand.u32 1, %s671_s20   ;;  %p900_p13 = scmp.ne.s32.totalorder %s894_s7, 0 }
 0x2ec   : > { %p901_p1 = scmp.ge.s32.totalorder %s683_s23, 2  ;;  %s451_s26 = scalar_lea.sflag [#allocation5], %s450_s24 }
 0x2ee   : > { %p550_p3 = pnand %p901_p1, %p900_p13 }
 0x2f0   : > { %p551_p5 = pneg %p550_p3 }
 0x2f2   : > { %666 = dma.done.wait (%p551_p5), %s451_s26, 256  }
 0x2f3   : > { %668 = vsyncadd (%p551_p5), %s451_s26, 4294967040  ;;  %p20_p8 = scmp.ge.s32.totalorder %s748_s25, 4   ;;  %s902_s20 = smov %s675_s21 }
 0x2f4   : > { %s903_s21 = smov %s679_s22  ;;  %s904_s22 = smov %s760_s28 }
 0x2f5   : > { %s905_s23 = smov %s748_s25  ;;  %22 = sbr.rel (!%p20_p8) target bundleno = 8 (0x8), region = 85 }
 0x2fa   :  { %456 = vsyncpa [#allocation4], 1 }
 0x2fb   :  { %458 = vsyncpa [#allocation4 + $0x1], 1 }
 0x2fc   :  { %459 = vsyncpa [#allocation5], 1 }
 0x2fd   :  { %461 = vsyncpa [#allocation5 + $0x1], 1 }

</bundles_post_ra>
